<compile_context>
chip_gen: v7x
topology: tpu7x:2x2x1
jax: 0.10.0
libtpu: 0.0.40
codegen_flags: <defaults>
</compile_context>

<pallas_src>
import functools

import jax
import jax.numpy as jnp
from jax.experimental import pallas as pl
from jax.experimental.pallas import tpu as pltpu


_SMEM = pl.BlockSpec(memory_space=pltpu.MemorySpace.SMEM)


# ---------------------------------------------------------------------------
# Kernels
# ---------------------------------------------------------------------------
def act_fused_kernel(state_ref, prev_ref, uw_prev_ref, hp_ref, rem_ref, nup_ref,
                     time_ref, pos_ref, w_ref, b_ref, step_ref,
                     prev_o_ref, senc_ref, uw_ref, hp_o_ref, rem_o_ref, nup_o_ref,
                     *, threshold):
    # state/prev/time: (TS, H); uw_prev/hp/rem/nup: (TS, 1) (tokens on sublanes)
    # pos: (MAX_HOP, H); w: (1, H); b/step: SMEM scalars.
    state = state_ref[...].astype(jnp.float32)

    # ---- Blend of the *previous* ACT step (uw_prev == 0 on the first step).
    # (TS,1) against (TS,H) is a cheap lane splat — no relayout.
    uw_prev = uw_prev_ref[...]
    prev = prev_ref[...].astype(jnp.float32)
    prev_o_ref[...] = (state * uw_prev + prev * (1.0 - uw_prev)).astype(prev_o_ref.dtype)

    # ---- Time / positional encodings for this step (pos row sliced in-kernel).
    step = step_ref[0]
    pos_row = pos_ref[pl.ds(step, 1), :].astype(jnp.float32)          # (1, H)
    s_enc = state + (time_ref[...].astype(jnp.float32) + pos_row)
    senc_ref[...] = s_enc.astype(senc_ref.dtype)

    # ---- Halting probability: VPU mul + XLU lane reduce + EUP exp.
    # (Deliberately NOT an MXU matmul against w reshaped (H,1).)
    w = w_ref[...].astype(jnp.float32)                                # (1, H)
    logits = jnp.sum(s_enc * w, axis=-1, keepdims=True) + b_ref[0]    # (TS, 1)
    p = 1.0 / (1.0 + jnp.exp(-logits))  # exact sigmoid (halting-threshold safe)

    hp = hp_ref[...]
    rem = rem_ref[...]
    nup = nup_ref[...]

    still_running = (hp < 1.0).astype(jnp.float32)
    combined = hp + p * still_running
    new_halted = (combined > threshold).astype(jnp.float32) * still_running
    still_running = (combined <= threshold).astype(jnp.float32) * still_running

    hp = hp + p * still_running
    rem = rem + new_halted * (1.0 - hp)
    hp = hp + new_halted * rem
    nup = nup + still_running + new_halted
    uw = p * still_running + new_halted * rem

    uw_ref[...] = uw
    hp_o_ref[...] = hp
    rem_o_ref[...] = rem
    nup_o_ref[...] = nup


def act_final_blend_kernel(state_ref, prev_ref, uw_ref, out_ref):
    # previous_state = state * uw + previous_state * (1 - uw)   (last ACT step)
    uw = uw_ref[...]                                              # (TS, 1)
    s = state_ref[...].astype(jnp.float32)
    p = prev_ref[...].astype(jnp.float32)
    out_ref[...] = (s * uw + p * (1.0 - uw)).astype(out_ref.dtype)


# ---------------------------------------------------------------------------
# Tiling helper + pallas_call wrappers
# ---------------------------------------------------------------------------
def _choose_token_tile(seq_len, hidden, dtype_bytes=4):
    """Largest per-batch-row token tile that fits a conservative VMEM budget.

    ~6 (TS,H) tiles live per grid step, double-buffered by the pipeline.
    16 MiB keeps us comfortably inside the scoped-VMEM defaults on
    v5e (16 MiB), v6e (32 MiB) and v7x (32 MiB scoped / 64 MiB physical).
    """
    budget = 16 * 1024 * 1024
    per_row = 12 * hidden * dtype_bytes
    max_rows = max(8, budget // per_row)
    if seq_len <= max_rows:
        return seq_len
    ts = min((max_rows // 8) * 8, (seq_len // 8) * 8)
    while ts >= 8 and seq_len % ts:
        ts -= 8
    # TODO(synk): pad ragged sequence lengths to a multiple of 8 instead of
    # falling back to a full-sequence block.
    return ts if ts >= 8 and seq_len % ts == 0 else seq_len


def _token_specs(ts, H):
    tok3 = lambda b, s: (b, s, 0)
    big = pl.BlockSpec((None, ts, H), tok3)      # (TS, H) in-kernel, H lane-dense
    small = pl.BlockSpec((None, ts, 1), tok3)    # (TS, 1) in-kernel, tokens on sublanes
    return big, small


_COMPILER_PARAMS = pltpu.CompilerParams(
    dimension_semantics=("parallel", "parallel"),   # megacore-shardable on v7x
    vmem_limit_bytes=32 * 1024 * 1024,
)


def act_fused_step(state, prev, uw_prev, hp, rem, nup,
                   time2d, pos2d, w2d, b1, step1, *, threshold, ts):
    B, S, H = state.shape
    max_hop = pos2d.shape[0]
    big, small = _token_specs(ts, H)
    time_spec = pl.BlockSpec((ts, H), lambda b, s: (s, 0))
    pos_spec = pl.BlockSpec((max_hop, H), lambda b, s: (0, 0))
    w_spec = pl.BlockSpec((1, H), lambda b, s: (0, 0))

    n_tok = B * S
    cost = pl.CostEstimate(
        flops=int(9 * n_tok * H + 30 * n_tok),
        transcendentals=int(n_tok),
        bytes_accessed=int(4 * (5 * n_tok * H + S * H + 12 * n_tok)),
    )
    kernel = functools.partial(act_fused_kernel, threshold=float(threshold))
    return pl.pallas_call(
        kernel,
        grid=(B, S // ts),
        in_specs=[big, big, small, small, small, small,
                  time_spec, pos_spec, w_spec, _SMEM, _SMEM],
        out_specs=(big, big, small, small, small, small),
        out_shape=(
            jax.ShapeDtypeStruct((B, S, H), state.dtype),   # blended previous_state
            jax.ShapeDtypeStruct((B, S, H), state.dtype),   # state + encodings
            jax.ShapeDtypeStruct((B, S, 1), jnp.float32),   # update_weights
            jax.ShapeDtypeStruct((B, S, 1), jnp.float32),   # halting_probability
            jax.ShapeDtypeStruct((B, S, 1), jnp.float32),   # remainders
            jax.ShapeDtypeStruct((B, S, 1), jnp.float32),   # n_updates
        ),
        # Donate every overwritten while-loop carry buffer.
        input_output_aliases={0: 1, 1: 0, 2: 2, 3: 3, 4: 4, 5: 5},
        compiler_params=_COMPILER_PARAMS,
        cost_estimate=cost,
    )(state, prev, uw_prev, hp, rem, nup, time2d, pos2d, w2d, b1, step1)


def act_final_blend(state, prev, uw, *, ts):
    B, S, H = state.shape
    big, small = _token_specs(ts, H)
    return pl.pallas_call(
        act_final_blend_kernel,
        grid=(B, S // ts),
        in_specs=[big, big, small],
        out_specs=big,
        out_shape=jax.ShapeDtypeStruct((B, S, H), state.dtype),
        input_output_aliases={1: 0},
        compiler_params=_COMPILER_PARAMS,
    )(state, prev, uw)


# ---------------------------------------------------------------------------
# Forward pass (matches ACT_basic.forward)
# ---------------------------------------------------------------------------
def act_basic_forward(state, inputs, time_enc, pos_enc, w, b, *, fn,
                      max_hop, threshold, encoder_output=None):
    B, S, H = inputs.shape
    ts = _choose_token_tile(S, H)

    hp0 = jnp.zeros((B, S, 1), jnp.float32)
    rem0 = jnp.zeros((B, S, 1), jnp.float32)
    nup0 = jnp.zeros((B, S, 1), jnp.float32)
    uw0 = jnp.zeros((B, S, 1), jnp.float32)     # blend is a no-op on step 0
    # NOTE: with bf16 activations keep an f32 previous_state accumulator to
    # avoid drift across ACT steps; here activations are f32 already.
    prev0 = jnp.zeros_like(inputs)

    time2d = jnp.reshape(time_enc[:, :S, :], (S, H)).astype(inputs.dtype)
    pos2d = jnp.reshape(pos_enc[:, :max_hop, :], (max_hop, H)).astype(inputs.dtype)
    w2d = jnp.reshape(w, (1, H)).astype(jnp.float32)
    b1 = jnp.reshape(jnp.asarray(b, jnp.float32), (1,))

    def cond(carry):
        _, _, _, hp, _, nup, _ = carry
        return jnp.any((hp < threshold) & (nup < max_hop))

    def body(carry):
        state, prev, uw, hp, rem, nup, step = carry
        step1 = jnp.reshape(step, (1,))
        prev, s_enc, uw, hp, rem, nup = act_fused_step(
            state, prev, uw, hp, rem, nup, time2d, pos2d, w2d, b1, step1,
            threshold=threshold, ts=ts)
        if encoder_output is not None:
            new_state, _ = fn((s_enc, encoder_output))
        else:
            new_state = fn(s_enc)
        return (new_state, prev, uw, hp, rem, nup, step + 1)

    carry = (state, prev0, uw0, hp0, rem0, nup0, jnp.int32(0))
    state_f, prev_f, uw_f, _, rem_f, nup_f, _ = jax.lax.while_loop(cond, body, carry)

    # The fused kernel applies step k's blend at the start of step k+1, so the
    # last step's blend is applied once here after the loop.
    prev_f = act_final_blend(state_f, prev_f, uw_f, ts=ts)

    return prev_f, (rem_f[..., 0], nup_f[..., 0])


# ---------------------------------------------------------------------------
# Pure-JAX reference (mirrors the PyTorch loop exactly)
# ---------------------------------------------------------------------------
def act_reference(state, inputs, fn, time_enc, pos_enc, max_hop, w, b, threshold):
    B, S, H = inputs.shape
    hp = jnp.zeros((B, S), jnp.float32)
    rem = jnp.zeros((B, S), jnp.float32)
    nup = jnp.zeros((B, S), jnp.float32)
    prev = jnp.zeros_like(inputs)
    step = 0
    while bool(jnp.any((hp < threshold) & (nup < max_hop))):
        state = state + time_enc[:, :S, :]
        state = state + pos_enc[:, step, :][:, None, :]
        p = 1.0 / (1.0 + jnp.exp(-(jnp.sum(state * w[None, None, :], axis=-1) + b)))
        still_running = (hp < 1.0).astype(jnp.float32)
        new_halted = ((hp + p * still_running) > threshold).astype(jnp.float32) * still_running
        still_running = ((hp + p * still_running) <= threshold).astype(jnp.float32) * still_running
        hp = hp + p * still_running
        rem = rem + new_halted * (1.0 - hp)
        hp = hp + new_halted * rem
        nup = nup + still_running + new_halted
        uw = p * still_running + new_halted * rem
        state = fn(state)
        prev = state * uw[..., None] + prev * (1.0 - uw[..., None])
        step += 1
    return prev, (rem, nup)


if __name__ == "__main__":
    B, S, H = 2, 8, 32
    MAX_HOP = 6
    THRESHOLD = 1.0 - 0.1

    key = jax.random.PRNGKey(0)
    k_in, k_time, k_pos, k_w, k_fn = jax.random.split(key, 5)

    inputs = jax.random.normal(k_in, (B, S, H), dtype=jnp.float32)
    state = inputs
    time_enc = 0.1 * jax.random.normal(k_time, (1, S, H), dtype=jnp.float32)
    pos_enc = 0.1 * jax.random.normal(k_pos, (1, MAX_HOP, H), dtype=jnp.float32)

    # Halting projection p = sigmoid(state @ w + b). The module inits the bias
    # to 1; here we use a negative bias so the demo exercises several ACT
    # steps, including tokens that hit the max_hop cap.
    w = 0.5 * jax.random.normal(k_w, (H,), dtype=jnp.float32)
    b = jnp.float32(-1.5)

    # Simple transition fn standing in for the Universal-Transformer layer.
    wf = jax.random.normal(k_fn, (H, H), dtype=jnp.float32) / jnp.sqrt(H)

    def fn(s):
        return jnp.tanh(jnp.dot(s, wf))

    forward = jax.jit(functools.partial(
        act_basic_forward, fn=fn, max_hop=MAX_HOP, threshold=THRESHOLD))
    prev, (rem, nup) = forward(state, inputs, time_enc, pos_enc, w, b)
    prev = jax.block_until_ready(prev)

    prev_ref, (rem_ref, nup_ref) = act_reference(
        state, inputs, fn, time_enc, pos_enc, MAX_HOP, w, b, THRESHOLD)

    assert jnp.allclose(prev, prev_ref, rtol=1e-4, atol=1e-4), (prev, prev_ref)
    assert jnp.allclose(rem, rem_ref, rtol=1e-4, atol=1e-4), (rem, rem_ref)
    assert jnp.allclose(nup, nup_ref, rtol=1e-4, atol=1e-4), (nup, nup_ref)

    print("KERNEL_OK")
</pallas_src>

<mosaic_0001>
module attributes {stable_mosaic.version = 11 : i64} {
  func.func @act_final_blend_kernel(%arg0: i32, %arg1: i32, %arg2: memref<1x8x32xf32, #tpu.memory_space<vmem>>, %arg3: memref<1x8x32xf32, #tpu.memory_space<vmem>>, %arg4: memref<1x8x1xf32, #tpu.memory_space<vmem>>, %arg5: memref<1x8x32xf32, #tpu.memory_space<vmem>>) attributes {dimension_semantics = [#tpu.dimension_semantics<parallel>, #tpu.dimension_semantics<parallel>], iteration_bounds = array<i64: 2, 1>, scalar_prefetch = 0 : i64, scratch_operands = 0 : i64, tpu.core_type = #tpu.core_type<tc>, window_params = [{transform_indices = @transform_0, window_bounds = array<i64: 1, 8, 32>}, {transform_indices = @transform_1, window_bounds = array<i64: 1, 8, 32>}, {transform_indices = @transform_2, window_bounds = array<i64: 1, 8, 1>}, {transform_indices = @transform_3, window_bounds = array<i64: 1, 8, 32>}]} {
    %c0 = arith.constant 0 : index
    %c0_0 = arith.constant 0 : index
    %c0_1 = arith.constant 0 : index
    %0 = vector.load %arg4[%c0, %c0_0, %c0_1] : memref<1x8x1xf32, #tpu.memory_space<vmem>>, vector<1x8x1xf32>
    %1 = vector.shape_cast %0 : vector<1x8x1xf32> to vector<8x1xf32>
    %c0_2 = arith.constant 0 : index
    %c0_3 = arith.constant 0 : index
    %c0_4 = arith.constant 0 : index
    %2 = vector.load %arg2[%c0_2, %c0_3, %c0_4] : memref<1x8x32xf32, #tpu.memory_space<vmem>>, vector<1x8x32xf32>
    %3 = vector.shape_cast %2 : vector<1x8x32xf32> to vector<8x32xf32>
    %c0_5 = arith.constant 0 : index
    %c0_6 = arith.constant 0 : index
    %c0_7 = arith.constant 0 : index
    %4 = vector.load %arg3[%c0_5, %c0_6, %c0_7] : memref<1x8x32xf32, #tpu.memory_space<vmem>>, vector<1x8x32xf32>
    %5 = vector.shape_cast %4 : vector<1x8x32xf32> to vector<8x32xf32>
    %6 = vector.broadcast %1 : vector<8x1xf32> to vector<8x32xf32>
    %7 = arith.mulf %3, %6 : vector<8x32xf32>
    %cst = arith.constant 1.000000e+00 : f32
    %8 = vector.broadcast %cst : f32 to vector<8x1xf32>
    %9 = arith.subf %8, %1 : vector<8x1xf32>
    %10 = vector.broadcast %9 : vector<8x1xf32> to vector<8x32xf32>
    %11 = arith.mulf %5, %10 : vector<8x32xf32>
    %12 = arith.addf %7, %11 : vector<8x32xf32>
    %c0_8 = arith.constant 0 : index
    %c0_9 = arith.constant 0 : index
    %c0_10 = arith.constant 0 : index
    %13 = vector.load %arg5[%c0_8, %c0_9, %c0_10] : memref<1x8x32xf32, #tpu.memory_space<vmem>>, vector<1x8x32xf32>
    %14 = vector.shape_cast %13 : vector<1x8x32xf32> to vector<8x32xf32>
    %15 = vector.shape_cast %12 : vector<8x32xf32> to vector<1x8x32xf32>
    tpu.vector_store %arg5[%c0_8, %c0_9, %c0_10], %15 {strides = array<i32>} : memref<1x8x32xf32, #tpu.memory_space<vmem>>, vector<1x8x32xf32>,
    return
  }
  func.func @transform_0(%arg0: i32, %arg1: i32) -> (i32, i32, i32) {
    %c0_i32 = arith.constant 0 : i32
    %c0_i32_0 = arith.constant 0 : i32
    return %arg0, %arg1, %c0_i32 : i32, i32, i32
  }
  func.func @transform_1(%arg0: i32, %arg1: i32) -> (i32, i32, i32) {
    %c0_i32 = arith.constant 0 : i32
    %c0_i32_0 = arith.constant 0 : i32
    return %arg0, %arg1, %c0_i32 : i32, i32, i32
  }
  func.func @transform_2(%arg0: i32, %arg1: i32) -> (i32, i32, i32) {
    %c0_i32 = arith.constant 0 : i32
    %c0_i32_0 = arith.constant 0 : i32
    return %arg0, %arg1, %c0_i32 : i32, i32, i32
  }
  func.func @transform_3(%arg0: i32, %arg1: i32) -> (i32, i32, i32) {
    %c0_i32 = arith.constant 0 : i32
    %c0_i32_0 = arith.constant 0 : i32
    return %arg0, %arg1, %c0_i32 : i32, i32, i32
  }
}

module attributes {stable_mosaic.version = 11 : i64} {
  func.func @act_fused_kernel(%arg0: i32, %arg1: i32, %arg2: memref<1x8x32xf32, #tpu.memory_space<vmem>>, %arg3: memref<1x8x32xf32, #tpu.memory_space<vmem>>, %arg4: memref<1x8x1xf32, #tpu.memory_space<vmem>>, %arg5: memref<1x8x1xf32, #tpu.memory_space<vmem>>, %arg6: memref<1x8x1xf32, #tpu.memory_space<vmem>>, %arg7: memref<1x8x1xf32, #tpu.memory_space<vmem>>, %arg8: memref<8x32xf32, #tpu.memory_space<vmem>>, %arg9: memref<6x32xf32, #tpu.memory_space<vmem>>, %arg10: memref<1x32xf32, #tpu.memory_space<vmem>>, %arg11: memref<1xf32, #tpu.memory_space<smem>>, %arg12: memref<1xi32, #tpu.memory_space<smem>>, %arg13: memref<1x8x32xf32, #tpu.memory_space<vmem>>, %arg14: memref<1x8x32xf32, #tpu.memory_space<vmem>>, %arg15: memref<1x8x1xf32, #tpu.memory_space<vmem>>, %arg16: memref<1x8x1xf32, #tpu.memory_space<vmem>>, %arg17: memref<1x8x1xf32, #tpu.memory_space<vmem>>, %arg18: memref<1x8x1xf32, #tpu.memory_space<vmem>>) attributes {dimension_semantics = [#tpu.dimension_semantics<parallel>, #tpu.dimension_semantics<parallel>], iteration_bounds = array<i64: 2, 1>, scalar_prefetch = 0 : i64, scratch_operands = 0 : i64, tpu.core_type = #tpu.core_type<tc>, window_params = [{transform_indices = @transform_0, window_bounds = array<i64: 1, 8, 32>}, {transform_indices = @transform_1, window_bounds = array<i64: 1, 8, 32>}, {transform_indices = @transform_2, window_bounds = array<i64: 1, 8, 1>}, {transform_indices = @transform_3, window_bounds = array<i64: 1, 8, 1>}, {transform_indices = @transform_4, window_bounds = array<i64: 1, 8, 1>}, {transform_indices = @transform_5, window_bounds = array<i64: 1, 8, 1>}, {transform_indices = @transform_6, window_bounds = array<i64: 8, 32>}, {pipeline_mode = #tpu.pipeline_mode<synchronous>, transform_indices = @transform_7, window_bounds = array<i64: 6, 32>}, {pipeline_mode = #tpu.pipeline_mode<synchronous>, transform_indices = @transform_8, window_bounds = array<i64: 1, 32>}, {transform_indices = @transform_9, window_bounds = array<i64: 1>}, {transform_indices = @transform_10, window_bounds = array<i64: 1>}, {transform_indices = @transform_11, window_bounds = array<i64: 1, 8, 32>}, {transform_indices = @transform_12, window_bounds = array<i64: 1, 8, 32>}, {transform_indices = @transform_13, window_bounds = array<i64: 1, 8, 1>}, {transform_indices = @transform_14, window_bounds = array<i64: 1, 8, 1>}, {transform_indices = @transform_15, window_bounds = array<i64: 1, 8, 1>}, {transform_indices = @transform_16, window_bounds = array<i64: 1, 8, 1>}]} {
    %c0 = arith.constant 0 : index
    %c0_0 = arith.constant 0 : index
    %c0_1 = arith.constant 0 : index
    %0 = vector.load %arg2[%c0, %c0_0, %c0_1] : memref<1x8x32xf32, #tpu.memory_space<vmem>>, vector<1x8x32xf32>
    %1 = vector.shape_cast %0 : vector<1x8x32xf32> to vector<8x32xf32>
    %c0_2 = arith.constant 0 : index
    %c0_3 = arith.constant 0 : index
    %c0_4 = arith.constant 0 : index
    %2 = vector.load %arg4[%c0_2, %c0_3, %c0_4] : memref<1x8x1xf32, #tpu.memory_space<vmem>>, vector<1x8x1xf32>
    %3 = vector.shape_cast %2 : vector<1x8x1xf32> to vector<8x1xf32>
    %c0_5 = arith.constant 0 : index
    %c0_6 = arith.constant 0 : index
    %c0_7 = arith.constant 0 : index
    %4 = vector.load %arg3[%c0_5, %c0_6, %c0_7] : memref<1x8x32xf32, #tpu.memory_space<vmem>>, vector<1x8x32xf32>
    %5 = vector.shape_cast %4 : vector<1x8x32xf32> to vector<8x32xf32>
    %6 = vector.broadcast %3 : vector<8x1xf32> to vector<8x32xf32>
    %7 = arith.mulf %1, %6 : vector<8x32xf32>
    %cst = arith.constant 1.000000e+00 : f32
    %8 = vector.broadcast %cst : f32 to vector<8x1xf32>
    %9 = arith.subf %8, %3 : vector<8x1xf32>
    %10 = vector.broadcast %9 : vector<8x1xf32> to vector<8x32xf32>
    %11 = arith.mulf %5, %10 : vector<8x32xf32>
    %12 = arith.addf %7, %11 : vector<8x32xf32>
    %c0_8 = arith.constant 0 : index
    %c0_9 = arith.constant 0 : index
    %c0_10 = arith.constant 0 : index
    %13 = vector.load %arg13[%c0_8, %c0_9, %c0_10] : memref<1x8x32xf32, #tpu.memory_space<vmem>>, vector<1x8x32xf32>
    %14 = vector.shape_cast %13 : vector<1x8x32xf32> to vector<8x32xf32>
    %15 = vector.shape_cast %12 : vector<8x32xf32> to vector<1x8x32xf32>
    tpu.vector_store %arg13[%c0_8, %c0_9, %c0_10], %15 {strides = array<i32>} : memref<1x8x32xf32, #tpu.memory_space<vmem>>, vector<1x8x32xf32>,
    %c0_11 = arith.constant 0 : index
    %16 = memref.load %arg12[%c0_11] : memref<1xi32, #tpu.memory_space<smem>>
    %17 = arith.index_cast %16 : i32 to index
    %c0_12 = arith.constant 0 : index
    %18 = vector.load %arg9[%17, %c0_12] : memref<6x32xf32, #tpu.memory_space<vmem>>, vector<1x32xf32>
    %c0_13 = arith.constant 0 : index
    %c0_14 = arith.constant 0 : index
    %19 = vector.load %arg8[%c0_13, %c0_14] : memref<8x32xf32, #tpu.memory_space<vmem>>, vector<8x32xf32>
    %20 = vector.broadcast %18 : vector<1x32xf32> to vector<8x32xf32>
    %21 = arith.addf %19, %20 : vector<8x32xf32>
    %22 = arith.addf %1, %21 : vector<8x32xf32>
    %c0_15 = arith.constant 0 : index
    %c0_16 = arith.constant 0 : index
    %c0_17 = arith.constant 0 : index
    %23 = vector.load %arg14[%c0_15, %c0_16, %c0_17] : memref<1x8x32xf32, #tpu.memory_space<vmem>>, vector<1x8x32xf32>
    %24 = vector.shape_cast %23 : vector<1x8x32xf32> to vector<8x32xf32>
    %25 = vector.shape_cast %22 : vector<8x32xf32> to vector<1x8x32xf32>
    tpu.vector_store %arg14[%c0_15, %c0_16, %c0_17], %25 {strides = array<i32>} : memref<1x8x32xf32, #tpu.memory_space<vmem>>, vector<1x8x32xf32>,
    %c0_18 = arith.constant 0 : index
    %c0_19 = arith.constant 0 : index
    %26 = vector.load %arg10[%c0_18, %c0_19] : memref<1x32xf32, #tpu.memory_space<vmem>>, vector<1x32xf32>
    %27 = vector.broadcast %26 : vector<1x32xf32> to vector<8x32xf32>
    %28 = arith.mulf %22, %27 : vector<8x32xf32>
    %cst_20 = arith.constant dense<0.000000e+00> : vector<8xf32>
    %29 = vector.multi_reduction <add>, %28, %cst_20 [1] : vector<8x32xf32> to vector<8xf32>
    %30 = vector.shape_cast %29 : vector<8xf32> to vector<8x1xf32>
    %c0_21 = arith.constant 0 : index
    %31 = memref.load %arg11[%c0_21] : memref<1xf32, #tpu.memory_space<smem>>
    %32 = vector.broadcast %31 : f32 to vector<8x1xf32>
    %33 = arith.addf %30, %32 : vector<8x1xf32>
    %cst_22 = arith.constant 0.000000e+00 : f32
    %34 = vector.broadcast %cst_22 : f32 to vector<8x1xf32>
    %35 = arith.subf %34, %33 : vector<8x1xf32>
    %36 = math.exp %35 : vector<8x1xf32>
    %cst_23 = arith.constant 1.000000e+00 : f32
    %37 = vector.broadcast %cst_23 : f32 to vector<8x1xf32>
    %38 = arith.addf %37, %36 : vector<8x1xf32>
    %cst_24 = arith.constant 1.000000e+00 : f32
    %39 = vector.broadcast %cst_24 : f32 to vector<8x1xf32>
    %40 = arith.divf %39, %38 : vector<8x1xf32>
    %c0_25 = arith.constant 0 : index
    %c0_26 = arith.constant 0 : index
    %c0_27 = arith.constant 0 : index
    %41 = vector.load %arg5[%c0_25, %c0_26, %c0_27] : memref<1x8x1xf32, #tpu.memory_space<vmem>>, vector<1x8x1xf32>
    %42 = vector.shape_cast %41 : vector<1x8x1xf32> to vector<8x1xf32>
    %c0_28 = arith.constant 0 : index
    %c0_29 = arith.constant 0 : index
    %c0_30 = arith.constant 0 : index
    %43 = vector.load %arg6[%c0_28, %c0_29, %c0_30] : memref<1x8x1xf32, #tpu.memory_space<vmem>>, vector<1x8x1xf32>
    %44 = vector.shape_cast %43 : vector<1x8x1xf32> to vector<8x1xf32>
    %c0_31 = arith.constant 0 : index
    %c0_32 = arith.constant 0 : index
    %c0_33 = arith.constant 0 : index
    %45 = vector.load %arg7[%c0_31, %c0_32, %c0_33] : memref<1x8x1xf32, #tpu.memory_space<vmem>>, vector<1x8x1xf32>
    %46 = vector.shape_cast %45 : vector<1x8x1xf32> to vector<8x1xf32>
    %cst_34 = arith.constant 1.000000e+00 : f32
    %47 = vector.broadcast %cst_34 : f32 to vector<8x1xf32>
    %48 = arith.cmpf olt, %42, %47 : vector<8x1xf32>
    %49 = arith.extui %48 : vector<8x1xi1> to vector<8x1xi32>
    %50 = arith.sitofp %49 : vector<8x1xi32> to vector<8x1xf32>
    %51 = arith.mulf %40, %50 : vector<8x1xf32>
    %52 = arith.addf %42, %51 : vector<8x1xf32>
    %cst_35 = arith.constant 0.899999976 : f32
    %53 = vector.broadcast %cst_35 : f32 to vector<8x1xf32>
    %54 = arith.cmpf ogt, %52, %53 : vector<8x1xf32>
    %55 = arith.extui %54 : vector<8x1xi1> to vector<8x1xi32>
    %56 = arith.sitofp %55 : vector<8x1xi32> to vector<8x1xf32>
    %57 = arith.mulf %56, %50 : vector<8x1xf32>
    %cst_36 = arith.constant 0.899999976 : f32
    %58 = vector.broadcast %cst_36 : f32 to vector<8x1xf32>
    %59 = arith.cmpf ole, %52, %58 : vector<8x1xf32>
    %60 = arith.extui %59 : vector<8x1xi1> to vector<8x1xi32>
    %61 = arith.sitofp %60 : vector<8x1xi32> to vector<8x1xf32>
    %62 = arith.mulf %61, %50 : vector<8x1xf32>
    %63 = arith.mulf %40, %62 : vector<8x1xf32>
    %64 = arith.addf %42, %63 : vector<8x1xf32>
    %cst_37 = arith.constant 1.000000e+00 : f32
    %65 = vector.broadcast %cst_37 : f32 to vector<8x1xf32>
    %66 = arith.subf %65, %64 : vector<8x1xf32>
    %67 = arith.mulf %57, %66 : vector<8x1xf32>
    %68 = arith.addf %44, %67 : vector<8x1xf32>
    %69 = arith.mulf %57, %68 : vector<8x1xf32>
    %70 = arith.addf %64, %69 : vector<8x1xf32>
    %71 = arith.addf %46, %62 : vector<8x1xf32>
    %72 = arith.addf %71, %57 : vector<8x1xf32>
    %73 = arith.mulf %40, %62 : vector<8x1xf32>
    %74 = arith.mulf %57, %68 : vector<8x1xf32>
    %75 = arith.addf %73, %74 : vector<8x1xf32>
    %c0_38 = arith.constant 0 : index
    %c0_39 = arith.constant 0 : index
    %c0_40 = arith.constant 0 : index
    %76 = vector.load %arg15[%c0_38, %c0_39, %c0_40] : memref<1x8x1xf32, #tpu.memory_space<vmem>>, vector<1x8x1xf32>
    %77 = vector.shape_cast %76 : vector<1x8x1xf32> to vector<8x1xf32>
    %78 = vector.shape_cast %75 : vector<8x1xf32> to vector<1x8x1xf32>
    tpu.vector_store %arg15[%c0_38, %c0_39, %c0_40], %78 {strides = array<i32>} : memref<1x8x1xf32, #tpu.memory_space<vmem>>, vector<1x8x1xf32>,
    %c0_41 = arith.constant 0 : index
    %c0_42 = arith.constant 0 : index
    %c0_43 = arith.constant 0 : index
    %79 = vector.load %arg16[%c0_41, %c0_42, %c0_43] : memref<1x8x1xf32, #tpu.memory_space<vmem>>, vector<1x8x1xf32>
    %80 = vector.shape_cast %79 : vector<1x8x1xf32> to vector<8x1xf32>
    %81 = vector.shape_cast %70 : vector<8x1xf32> to vector<1x8x1xf32>
    tpu.vector_store %arg16[%c0_41, %c0_42, %c0_43], %81 {strides = array<i32>} : memref<1x8x1xf32, #tpu.memory_space<vmem>>, vector<1x8x1xf32>,
    %c0_44 = arith.constant 0 : index
    %c0_45 = arith.constant 0 : index
    %c0_46 = arith.constant 0 : index
    %82 = vector.load %arg17[%c0_44, %c0_45, %c0_46] : memref<1x8x1xf32, #tpu.memory_space<vmem>>, vector<1x8x1xf32>
    %83 = vector.shape_cast %82 : vector<1x8x1xf32> to vector<8x1xf32>
    %84 = vector.shape_cast %68 : vector<8x1xf32> to vector<1x8x1xf32>
    tpu.vector_store %arg17[%c0_44, %c0_45, %c0_46], %84 {strides = array<i32>} : memref<1x8x1xf32, #tpu.memory_space<vmem>>, vector<1x8x1xf32>,
    %c0_47 = arith.constant 0 : index
    %c0_48 = arith.constant 0 : index
    %c0_49 = arith.constant 0 : index
    %85 = vector.load %arg18[%c0_47, %c0_48, %c0_49] : memref<1x8x1xf32, #tpu.memory_space<vmem>>, vector<1x8x1xf32>
    %86 = vector.shape_cast %85 : vector<1x8x1xf32> to vector<8x1xf32>
    %87 = vector.shape_cast %72 : vector<8x1xf32> to vector<1x8x1xf32>
    tpu.vector_store %arg18[%c0_47, %c0_48, %c0_49], %87 {strides = array<i32>} : memref<1x8x1xf32, #tpu.memory_space<vmem>>, vector<1x8x1xf32>,
    return
  }
  func.func @transform_0(%arg0: i32, %arg1: i32) -> (i32, i32, i32) {
    %c0_i32 = arith.constant 0 : i32
    %c0_i32_0 = arith.constant 0 : i32
    return %arg0, %arg1, %c0_i32 : i32, i32, i32
  }
  func.func @transform_1(%arg0: i32, %arg1: i32) -> (i32, i32, i32) {
    %c0_i32 = arith.constant 0 : i32
    %c0_i32_0 = arith.constant 0 : i32
    return %arg0, %arg1, %c0_i32 : i32, i32, i32
  }
  func.func @transform_2(%arg0: i32, %arg1: i32) -> (i32, i32, i32) {
    %c0_i32 = arith.constant 0 : i32
    %c0_i32_0 = arith.constant 0 : i32
    return %arg0, %arg1, %c0_i32 : i32, i32, i32
  }
  func.func @transform_3(%arg0: i32, %arg1: i32) -> (i32, i32, i32) {
    %c0_i32 = arith.constant 0 : i32
    %c0_i32_0 = arith.constant 0 : i32
    return %arg0, %arg1, %c0_i32 : i32, i32, i32
  }
  func.func @transform_4(%arg0: i32, %arg1: i32) -> (i32, i32, i32) {
    %c0_i32 = arith.constant 0 : i32
    %c0_i32_0 = arith.constant 0 : i32
    return %arg0, %arg1, %c0_i32 : i32, i32, i32
  }
  func.func @transform_5(%arg0: i32, %arg1: i32) -> (i32, i32, i32) {
    %c0_i32 = arith.constant 0 : i32
    %c0_i32_0 = arith.constant 0 : i32
    return %arg0, %arg1, %c0_i32 : i32, i32, i32
  }
  func.func @transform_6(%arg0: i32, %arg1: i32) -> (i32, i32) {
    %c0_i32 = arith.constant 0 : i32
    %c0_i32_0 = arith.constant 0 : i32
    return %arg1, %c0_i32 : i32, i32
  }
  func.func @transform_7(%arg0: i32, %arg1: i32) -> (i32, i32) {
    %c0_i32 = arith.constant 0 : i32
    %c0_i32_0 = arith.constant 0 : i32
    %c0_i32_1 = arith.constant 0 : i32
    return %c0_i32, %c0_i32_0 : i32, i32
  }
  func.func @transform_8(%arg0: i32, %arg1: i32) -> (i32, i32) {
    %c0_i32 = arith.constant 0 : i32
    %c0_i32_0 = arith.constant 0 : i32
    %c0_i32_1 = arith.constant 0 : i32
    return %c0_i32, %c0_i32_0 : i32, i32
  }
  func.func @transform_9(%arg0: i32, %arg1: i32) -> i32 {
    %c0_i32 = arith.constant 0 : i32
    %c0_i32_0 = arith.constant 0 : i32
    return %c0_i32 : i32
  }
  func.func @transform_10(%arg0: i32, %arg1: i32) -> i32 {
    %c0_i32 = arith.constant 0 : i32
    %c0_i32_0 = arith.constant 0 : i32
    return %c0_i32 : i32
  }
  func.func @transform_11(%arg0: i32, %arg1: i32) -> (i32, i32, i32) {
    %c0_i32 = arith.constant 0 : i32
    %c0_i32_0 = arith.constant 0 : i32
    return %arg0, %arg1, %c0_i32 : i32, i32, i32
  }
  func.func @transform_12(%arg0: i32, %arg1: i32) -> (i32, i32, i32) {
    %c0_i32 = arith.constant 0 : i32
    %c0_i32_0 = arith.constant 0 : i32
    return %arg0, %arg1, %c0_i32 : i32, i32, i32
  }
  func.func @transform_13(%arg0: i32, %arg1: i32) -> (i32, i32, i32) {
    %c0_i32 = arith.constant 0 : i32
    %c0_i32_0 = arith.constant 0 : i32
    return %arg0, %arg1, %c0_i32 : i32, i32, i32
  }
  func.func @transform_14(%arg0: i32, %arg1: i32) -> (i32, i32, i32) {
    %c0_i32 = arith.constant 0 : i32
    %c0_i32_0 = arith.constant 0 : i32
    return %arg0, %arg1, %c0_i32 : i32, i32, i32
  }
  func.func @transform_15(%arg0: i32, %arg1: i32) -> (i32, i32, i32) {
    %c0_i32 = arith.constant 0 : i32
    %c0_i32_0 = arith.constant 0 : i32
    return %arg0, %arg1, %c0_i32 : i32, i32, i32
  }
  func.func @transform_16(%arg0: i32, %arg1: i32) -> (i32, i32, i32) {
    %c0_i32 = arith.constant 0 : i32
    %c0_i32_0 = arith.constant 0 : i32
    return %arg0, %arg1, %c0_i32 : i32, i32, i32
  }
}

</mosaic_0001>

<bundles_post_ra>
// kernel: act_basic_forward.1
= control target key start
LH: loop header
LB: loop body
LE: loop exit
PB: predicated region body
PF: predicated region fallthrough
CT: control target
= control target key end

     0   :  { %s458_s12 = smov 0   ;;  %s460_s13 = smov 0   ;;  %s494_s0 = inlined_call_operand.vmem [shape: f32[2,8,32], index: 0, kind: input, shape index: {}]   ;;  %s495_s1 = inlined_call_operand.vmem [shape: f32[2,8,32], index: 1, kind: input, shape index: {}, may-alias: {1,3}]   ;;  %s496_s2 = inlined_call_operand.vmem [shape: f32[2,8,1], index: 2, kind: input, shape index: {}]   ;;  %s497_s3 = inlined_call_operand.vmem [shape: f32[2,8,32], index: 3, kind: output, shape index: {}, may-alias: {1,3}]  }
   0x1   :  { %s462_s14 = smov 0  }
   0x2 LB: > { %s25_s15 = sadd.s32 1, %s431_s13  ;;  %p380_p0 = scmp.ge.s32.totalorder %s435_s14, 1  ;;  %s435_s14 = sphi %s462_s14, %s13_s14   ;;  %s431_s13 = sphi %s460_s13, %s499_s13   ;;  %s427_s12 = sphi %s458_s12, %s498_s12  }
   0x3   : > { %p27_p1 = scmp.ge.s32.totalorder %s25_s15, 2  ;;  %p183_p2 = scmp.lt.s32.totalorder %s435_s14, 3 }
   0x5   : > { %s501_s15 = smov (%p27_p1, %s25_s15), 0  ;;  %p184_p3 = pnand %p380_p0, %p183_p2 }
   0x6   : > { %p225_p4 = scmp.lt.s32.totalorder (!%p184_p3), %s427_s12, 1  ;;  %v437_v0 = vmov (!%p184_p3), 0   ;;  %vm270_vm0 = vcmask (!%p184_p3), 261120  }
   0x7   : > { %187 = sbr.rel (%p184_p3) target bundleno = 155 (0x9b), region = 32  ;;  %412 = vset.pattern.permute.xlu0 (!%p184_p3), %v437_v0 }
   0xe   : > { %s503_s12 = smov (!%p225_p4, %s427_s12), 1 }
   0xf   : > { %s381_s16 = sshll.u32 %s503_s12, 3 }
  0x10   : > { %s245_s19 = scalar_lea.vmem %s496_s2, %s381_s16  ;;  %s231_s22 = scalar_lea.vmem %s494_s0, %s381_s16 }
  0x11   : > { %v253_v1 = vld [vmem:[%s245_s19] sm:$0xff]  ;;  %s238_s25 = scalar_lea.vmem %s495_s1, %s381_s16  ;;  %s252_s28 = scalar_lea.vmem %s497_s3, %s381_s16 }
  0x12   : > { %258 = vperm.xlu0 %412, %v253_v1   ;;  %v262_v2 = vsub.f32 1.0, %v253_v1  ;;  %v254_v4 = vld [vmem:[%s231_s22] sm:$0xff] }
  0x13   : > { %v255_v5 = vld [vmem:[%s238_s25] sm:$0xff] }
  0x16   : > { %265 = vperm.xlu0 %412, %v262_v2  }
  0x91   : > { %v259_v3 = vpop.permute.xlu0 %258 }
  0x92   : > { %v261_v7 = vmul.f32 %v259_v3, %v254_v4 }
  0x95   : > { %v266_v6 = vpop.permute.xlu0 %265 }
  0x96   : > { %v268_v8 = vmul.f32 %v266_v6, %v255_v5 }
  0x98   : > { %v269_v9 = vadd.f32 %v268_v8, %v261_v7 }
  0x9a   : > { %271 = vst.msk [vmem:[%s252_s28] sm:$0xff] %vm270_vm0, %v269_v9 }
  0x9b PF: > { %s13_s14 = sadd.s32 1, %s435_s14   ;;  %s498_s12 = smov %s431_s13 }
  0x9c   : > { %p10_p5 = scmp.ge.s32.totalorder %s13_s14, 4   ;;  %s499_s13 = smov %s501_s15 }
  0x9e   :  { %12 = sbr.rel (!%p10_p5) target bundleno = 2 (0x2), region = 68 }

// kernel: body.3
= control target key start
LH: loop header
LB: loop body
LE: loop exit
PB: predicated region body
PF: predicated region fallthrough
CT: control target
= control target key end

     0   :  { %s2007_s0 = inlined_call_operand.vmem [shape: f32[2,8,32], index: 0, kind: input, shape index: {}, may-alias: {0,12}]   ;;  %s2008_s1 = inlined_call_operand.vmem [shape: f32[2,8,32], index: 1, kind: input, shape index: {}, may-alias: {1,11}]   ;;  %s2009_s2 = inlined_call_operand.vmem [shape: f32[2,8,1], index: 2, kind: input, shape index: {}, may-alias: {2,13}]   ;;  %s2010_s3 = inlined_call_operand.hbm [shape: f32[2,8,1], index: 3, kind: input, shape index: {}, may-alias: {3,14}]   ;;  %s2011_s4 = inlined_call_operand.vmem [shape: f32[2,8,1], index: 4, kind: input, shape index: {}, may-alias: {4,15}]   ;;  %s2012_s5 = inlined_call_operand.hbm [shape: f32[2,8,1], index: 5, kind: input, shape index: {}, may-alias: {5,16}]   ;;  %s2013_s6 = inlined_call_operand.vmem [shape: f32[8,32], index: 6, kind: input, shape index: {}]   ;;  %s2014_s7 = inlined_call_operand.vmem [shape: f32[6,32], index: 7, kind: input, shape index: {}]   ;;  %s2015_s8 = inlined_call_operand.vmem [shape: f32[1,32], index: 8, kind: input, shape index: {}]   ;;  %s2016_s9 = inlined_call_operand.<no memory space> [shape: f32[1], index: 9, kind: input, shape index: {}]   ;;  %s2017_s10 = inlined_call_operand.<no memory space> [shape: s32[1], index: 10, kind: input, shape index: {}]   ;;  %s2018_s11 = inlined_call_operand.vmem [shape: f32[2,8,32], index: 11, kind: output, shape index: {0}, may-alias: {1,11}]   ;;  %s2019_s12 = inlined_call_operand.vmem [shape: f32[2,8,32], index: 12, kind: output, shape index: {1}, may-alias: {0,12}]   ;;  %s2020_s13 = inlined_call_operand.vmem [shape: f32[2,8,1], index: 13, kind: output, shape index: {2}, may-alias: {2,13}]   ;;  %s2021_s14 = inlined_call_operand.hbm [shape: f32[2,8,1], index: 14, kind: output, shape index: {3}, may-alias: {3,14}]   ;;  %s2022_s15 = inlined_call_operand.vmem [shape: f32[2,8,1], index: 15, kind: output, shape index: {4}, may-alias: {4,15}]   ;;  %s2023_s16 = inlined_call_operand.hbm [shape: f32[2,8,1], index: 16, kind: output, shape index: {5}, may-alias: {5,16}]  }
   0x1   :  { %2035 = sst [smem:[#allocation23_spill]] %s2007_s0 }
   0x2   :  { %2036 = sst [smem:[#allocation24_spill]] %s2010_s3 }
   0x3   :  { %2037 = sst [smem:[#allocation25_spill]] %s2012_s5 }
   0x4   :  { %2038 = sst [smem:[#allocation26_spill]] %s2021_s14 }
   0x5   :  { %22 = sst [smem:[#allocation2]] %s2016_s9 }
   0x6   :  { %23 = sst [smem:[#allocation3]] %s2017_s10 }
   0x7   :  { %24 = vsyncpa [#allocation5], 0 }
   0x8   :  { %26 = vsyncpa [#allocation5 + $0x1], 0 }
   0x9   :  { %27 = vsyncpa [#allocation8], 0 }
   0xa   :  { %29 = vsyncpa [#allocation8 + $0x1], 0 }
   0xb   :  { %30 = vsyncpa [#allocation6], 0 }
   0xc   :  { %32 = vsyncpa [#allocation6 + $0x1], 0 }
   0xd   :  { %33 = vsyncpa [#allocation11], 0 }
   0xe   :  { %35 = vsyncpa [#allocation11 + $0x1], 0  ;;  %s1692_s25 = smov 0   ;;  %s1694_s26 = smov 0  }
   0xf   :  { %s1696_s27 = smov 0   ;;  %s1698_s28 = smov 0  }
  0x10   :  { %s1700_s9 = smov 0   ;;  %s1702_s29 = smov 0  }
  0x11 LB: > { %2039 = sst [smem:[#allocation16_spill]] %s1573_s25  ;;  %s1302_s10 = sadd.s32 4294967295, %s1593_s29   ;;  %s1593_s29 = sphi %s1702_s29, %s41_s29   ;;  %s1589_s9 = sphi %s1700_s9, %s2073_s9   ;;  %s1585_s28 = sphi %s1698_s28, %s2072_s28   ;;  %s1581_s27 = sphi %s1696_s27, %s2071_s27   ;;  %s1577_s26 = sphi %s1694_s26, %s2070_s26   ;;  %s1573_s25 = sphi %s1692_s25, %s2069_s25  }
  0x12   : > { %2040 = sst [smem:[#allocation17_spill]] %s1577_s26  ;;  %s1303_s30 = sadd.s32 4294967294, %s1593_s29  }
  0x13   : > { %2041 = sst [smem:[#allocation18_spill]] %s1581_s27  ;;  %s53_s0 = sadd.s32 1, %s1589_s9 }
  0x14   : > { %2042 = sst [smem:[#allocation19_spill]] %s1589_s9  ;;  %s146_s17 = sadd.s32 1, %s1581_s27 }
  0x15   : > { %p55_p0 = scmp.ge.s32.totalorder %s53_s0, 2  ;;  %p153_p1 = scmp.ne.s32.totalorder %s1581_s27, %s1577_s26 }
  0x16   : > { %p154_p2 = scmp.eq.s32.totalorder %s1593_s29, 0  ;;  %p159_p3 = scmp.ne.s32.totalorder %s1577_s26, %s1573_s25 }
  0x17   : > { %s2075_s0 = smov (%p55_p0, %s53_s0), 0  ;;  %p160_p5 = scmp.eq.s32.totalorder %s1302_s10, 0 }
  0x18   : > { %2043 = sst [smem:[#allocation20_spill]] %s2075_s0  ;;  %p1733_p4 = por %p154_p2, %p153_p1 }
  0x19   : > { %s141_s19 = ssub.s32 %s1589_s9, %s2075_s0  ;;  %p435_p6 = scmp.eq.s32.totalorder %s1302_s10, 1 }
  0x1a   : > { %p144_p7 = scmp.eq.s32.totalorder %s141_s19, 0  ;;  %p1739_p8 = por %p160_p5, %p159_p3 }
  0x1b   : > { %p1743_p9 = por %p435_p6, %p153_p1  ;;  %p441_p10 = scmp.eq.s32.totalorder %s1303_s30, 1 }
  0x1c   : > { %s2045_s20 = scalar_select %p1739_p8, 1, 0 }
  0x1d   : > { %s2046_s21 = scalar_select %p1743_p9, 1, 0 }
  0x1e   : > { %s1748_s22 = scalar_select %p144_p7, %s1581_s27, %s146_s17  }
  0x1f   : > { %p1750_p11 = por %p441_p10, %p159_p3  ;;  %p1357_p13 = scmp.lt.s32.totalorder %s1593_s29, 2 }
  0x20   : > { %2047 = sst [smem:[#allocation21_spill]] %s1748_s22  ;;  %s1757_s24 = sand.u32 1, %s1581_s27  }
  0x21   : > { %s2048_s23 = scalar_select %p1750_p11, 1, 0 }
  0x22   : > { %s2027_s10 = sshll.u32 %s1757_s24, 3  ;;  %s2028_s19 = sshll.u32 %s1589_s9, 7 }
  0x23   : > { %2049 = sst [smem:[#allocation22_spill]] %s2048_s23  ;;  %s2050_s3 = sld [smem:[#allocation24_spill]] }
  0x24   : > { %s570_s17 = scalar_lea.vmem [#allocation4], %s2027_s10  ;;  %p1774_p0 = pnand %p1357_p13, %p1733_p4 }
  0x25   : > { %s578_s22 = sshll.u32 %s570_s17, 4  ;;  %s567_s25 = scalar_lea.sflag [#allocation5], %s1757_s24  ;;  %s1770_s22 = int_to_ptr.vmem [resolvable:$true] %s578_s22 }
  0x26   : > { %p1417_p5 = pneg %p1774_p0 }
  0x29   : > { %s1766_s30 = scalar_lea.hbm %s2050_s3, %s2028_s19  ;;  %s1420_s18 = scalar_lea.hbm %s2050_s3, 256 }
  0x2a   : > { %s1415_s0 = scalar_lea.hbm %s1766_s30, 128  ;;  %p1421_p4 = scmp.lt.u32.totalorder %s1766_s30, %s2050_s3 }
  0x2b   : > { %p1416_p3 = scmp.ne.s32.totalorder %s1766_s30, %s1415_s0  ;;  %p1422_p10 = scmp.lt.u32.totalorder %s1420_s18, %s1415_s0 }
  0x2c   : > { %p1424_p12 = scmp.lt.u32.totalorder %s1415_s0, %s1766_s30 }
  0x2d   : > { %p1418_p6 = pnand %p1417_p5, %p1416_p3  ;;  %p1423_p13 = por %p1422_p10, %p1421_p4 }
  0x2f   : > { %p1419_p7 = pneg %p1418_p6  ;;  %p1425_p1 = por %p1424_p12, %p1423_p13 }
  0x31   : > { %p1426_p2 = pnand %p1425_p1, %p1419_p7 }
  0x33   : > { %1429 = shalt.err (!%p1426_p2)
}
  0x34   : > { %s1430_s14 = scalar_lea.vmem %s1770_s22, 128  ;;  %s1595_s10 = smov [#allocation4]  }
  0x35   : > { %p1431_p3 = scmp.ne.s32.totalorder %s1770_s22, %s1430_s14  ;;  %s1435_s17 = sshll.u32 %s1595_s10, 4  ;;  %s1436_s17 = int_to_ptr.vmem [resolvable:$false] %s1435_s17 }
  0x36   : > { %s1437_s23 = scalar_lea.vmem %s1436_s17, 256  ;;  %p1438_p9 = scmp.lt.s32.totalorder %s1770_s22, %s1436_s17 }
  0x37   : > { %p1433_p6 = pnand %p1431_p3, %p1417_p5  ;;  %p1439_p4 = scmp.lt.s32.totalorder %s1437_s23, %s1430_s14 }
  0x39   : > { %p1434_p11 = pneg %p1433_p6  ;;  %p1440_p10 = por %p1439_p4, %p1438_p9 }
  0x3b   : > { %p1441_p12 = pnand %p1440_p10, %p1434_p11 }
  0x3d   : > { %1444 = shalt.err (!%p1441_p12)
}
  0x3e   : > { %1346 = dma.hbm_to_vmem [thread:$0]  (!%p1774_p0), %s1766_s30, 128, %s1770_s22, %s567_s25  }
  0x3f   : > { %p2052_p1 = scmp.lt.s32.totalorder %s1593_s29, 3  ;;  %p2053_p2 = scmp.ge.s32.totalorder %s1593_s29, 1 }
  0x40   : > { %s2055_s14 = sshll.u32 %s1589_s9, 7  ;;  %s2056_s5 = sld [smem:[#allocation25_spill]] }
  0x41   : > { %p1810_p7 = pnand %p2053_p2, %p2052_p1  ;;  %s2057_s17 = sshll.u32 %s1757_s24, 3 }
  0x42   : > { %s599_s23 = scalar_lea.vmem [#allocation7], %s2057_s17  ;;  %s596_s22 = scalar_lea.sflag [#allocation8], %s1757_s24 }
  0x43   : > { %s2054_s19 = scalar_select %p1810_p7, 1, 0 }
  0x44   : > { %s607_s3 = sshll.u32 %s599_s23, 4  ;;  %s608_s3 = int_to_ptr.vmem [resolvable:$true] %s607_s3 }
  0x46   : > { %s1819_s10 = scalar_lea.hbm %s2056_s5, %s2055_s14  ;;  %s1450_s14 = scalar_lea.hbm %s2056_s5, 256 }
  0x47   : > { %s1445_s30 = scalar_lea.hbm %s1819_s10, 128  ;;  %p1451_p3 = scmp.lt.u32.totalorder %s1819_s10, %s2056_s5 }
  0x48   : > { %p1446_p9 = scmp.ne.s32.totalorder %s1819_s10, %s1445_s30  ;;  %p1452_p6 = scmp.lt.u32.totalorder %s1450_s14, %s1445_s30 }
  0x49   : > { %p1454_p10 = scmp.lt.u32.totalorder %s1445_s30, %s1819_s10 }
  0x4a   : > { %p1448_p11 = pnand %p1446_p9, %p1417_p5  ;;  %p1453_p4 = por %p1452_p6, %p1451_p3 }
  0x4c   : > { %p1449_p13 = pneg %p1448_p11  ;;  %p1455_p12 = por %p1454_p10, %p1453_p4 }
  0x4e   : > { %p1456_p1 = pnand %p1455_p12, %p1449_p13 }
  0x50   : > { %1459 = shalt.err (!%p1456_p1)
}
  0x51   : > { %s1460_s24 = scalar_lea.vmem %s608_s3, 128  ;;  %s1596_s17 = smov [#allocation7]  }
  0x52   : > { %p1461_p2 = scmp.ne.s32.totalorder %s608_s3, %s1460_s24  ;;  %s1465_s9 = sshll.u32 %s1596_s17, 4  ;;  %s1466_s9 = int_to_ptr.vmem [resolvable:$false] %s1465_s9 }
  0x53   : > { %s1467_s23 = scalar_lea.vmem %s1466_s9, 256  ;;  %p1468_p8 = scmp.lt.s32.totalorder %s608_s3, %s1466_s9 }
  0x54   : > { %p1463_p9 = pnand %p1461_p2, %p1417_p5  ;;  %p1469_p7 = scmp.lt.s32.totalorder %s1467_s23, %s1460_s24 }
  0x56   : > { %p1464_p11 = pneg %p1463_p9  ;;  %p1470_p3 = por %p1469_p7, %p1468_p8 }
  0x58   : > { %p1471_p6 = pnand %p1470_p3, %p1464_p11 }
  0x5a   : > { %1474 = shalt.err (!%p1471_p6)
}
  0x5b   : > { %1349 = dma.hbm_to_vmem [thread:$0]  (!%p1774_p0), %s1819_s10, 128, %s608_s3, %s596_s22  }
  0x5c   : > { %p2058_p13 = scmp.ne.s32.totalorder %s2054_s19, 0 }
  0x5d   : > { %s1846_s30 = sand.u32 (!%p2058_p13), 1, %s1577_s26   ;;  %p2059_p8 = scmp.ne.s32.totalorder (!%p2058_p13), %s2045_s20, 0 }
  0x5e   : > { %616 = sbr.rel (%p2058_p13) target bundleno = 346 (0x15a), region = 64  ;;  %s1849_s25 = sshll.u32 (!%p2058_p13), %s1846_s30, 3 }
  0x5f   : > { %s619_s14 = scalar_lea.sflag (!%p2058_p13), [#allocation5], %s1846_s30 }
  0x65   : > { %1556 = dma.done.wait (%p2059_p8), %s619_s14, 128  }
  0x66   : > { %1558 = vsyncadd (%p2059_p8), %s619_s14, 4294967168  ;;  %s628_s3 = scalar_lea.sflag [#allocation8], %s1846_s30 }
  0x67   : > { %1560 = dma.done.wait (%p2059_p8), %s628_s3, 128  }
  0x68   : > { %1562 = vsyncadd (%p2059_p8), %s628_s3, 4294967168  ;;  %p750_p0 = scmp.lt.s32.totalorder %s1585_s28, 1  ;;  %s829_s19 = sld [smem:[#allocation3]]  ;;  %v1597_v0 = vmov 0   ;;  %v832_v1 = vld [vmem:[%s2013_s6] sm:$0xff]  ;;  %vm827_vm0 = vcmask 261120  }
  0x69   : > { %1410 = vset.pattern.permute.xlu1 %v1597_v0  ;;  %1409 = vset.pattern.permute.xlu0 %v1597_v0  ;;  %s2060_s17 = sld [smem:[#allocation23_spill]]  ;;  %v1325_v7 = vld [vmem:[%s2015_s8] ss:$0 sm:$0xff]  ;;  %v1598_v25 = vmov 0.0   ;;  %s2062_s3 = scalar_lea.vmem [#allocation7], %s1849_s25  ;;  %vm886_vm4 = vcmask 7168  }
  0x6a   : > { %s751_s10 = scalar_select %p750_p0, %s1585_s28, 1  ;;  %v862_v32 = vld [vmem:[%s2062_s3] sm:$0xff] }
  0x6b   : > { %s851_s5 = sld [smem:[#allocation2]]  ;;  %s749_s18 = scalar_lea.vmem [#allocation10], %s1849_s25 }
  0x6c   : > { %s1865_s22 = sshll.u32 %s751_s10, 3  ;;  %s1331_s10 = sshll.u32 %s1585_s28, 7 }
  0x6d   : > { %s770_s14 = scalar_lea.vmem %s2009_s2, %s1865_s22  ;;  %s795_s24 = scalar_lea.vmem %s2019_s12, %s1865_s22 }
  0x6e   : > { %s830_s0 = scalar_lea.vmem %s2014_s7, %s829_s19  ;;  %v811_v4 = vld [vmem:[%s770_s14] sm:$0xff]  ;;  %s763_s27 = scalar_lea.vmem %s2008_s1, %s1865_s22 }
  0x6f   : > { %s756_s9 = scalar_lea.vmem %s2060_s17, %s1865_s22  ;;  %v1324_v3 = vld [vmem:[%s830_s0] ss:$0 sm:$0xff]  ;;  %v819_v6 = vsub.f32 1.0, %v811_v4  ;;  %s788_s20 = scalar_lea.vmem %s2018_s11, %s1865_s22 }
  0x70   : > { %v810_v2 = vld [vmem:[%s756_s9] sm:$0xff]  ;;  %v837_v5 = vadd.f32 %v1324_v3, %v832_v1  ;;  %s2061_s14 = scalar_lea.vmem [#allocation4], %s1849_s25  ;;  %s925_s19 = scalar_lea.sflag [#allocation11], %s1846_s30 }
  0x71   : > { %822 = vperm.xlu1 %1410, %v819_v6   ;;  %v852_v11 = vstv %s851_s5  ;;  %v812_v15 = vld [vmem:[%s763_s27] sm:$0xff]  ;;  %s777_s5 = scalar_lea.vmem %s2011_s4, %s1865_s22  ;;  %s1914_s27 = scalar_lea.hbm %s2023_s16, %s1331_s10 }
  0x72   : > { %v838_v8 = vadd.f32 %v837_v5, %v810_v2  ;;  %v860_v24 = vld [vmem:[%s2061_s14] sm:$0xff]  ;;  %p2063_p7 = scmp.ne.s32.totalorder %s2046_s21, 0 }
  0x73   : > { %vm863_vm1 = vcmp.lt.f32.partialorder %v860_v24, 1.0  ;;  %v861_v40 = vld [vmem:[%s777_s5] sm:$0xff] }
  0x74   : > { %v847_v9 = vmul.f32 %v1325_v7, %v838_v8  ;;  %839 = vst.msk [vmem:[%s795_s24] sm:$0xff] %vm827_vm0, %v838_v8  ;;  %v1326_v26 = vsel %vm863_vm1, 1.0, %v1598_v25  ;;  %s965_s24 = sshll.u32 %s749_s18, 4  ;;  %s1916_s24 = int_to_ptr.vmem [resolvable:$true] %s965_s24 }
  0x75   : > { %s1475_s9 = scalar_lea.vmem %s1916_s24, 128 }
  0x76   : > { %v848_v10 = vsel %vm827_vm0, %v847_v9, 0.0  ;;  %p1476_p5 = scmp.ne.s32.totalorder %s1916_s24, %s1475_s9 }
  0x77   : > { %849 = vadd.xlane.f32.xlu0 %v848_v10 }
  0x78   : > { %p1477_p4 = pnand %p1476_p5, %p2063_p7 }
  0x7a   : > { %p1478_p10 = pneg %p1477_p4 }
  0x8d   : > { %815 = vperm.xlu0 %1409, %v811_v4  }
  0xf0   : > { %v823_v16 = vpop.permute.xlu1 %822 }
  0xf1   : > { %v825_v18 = vmul.f32 %v823_v16, %v812_v15 }
 0x104   : > { %v850_v12 = vpop.xlane.xlu0 %849 }
 0x105   : > { %v853_v13 = vadd.f32 %v852_v11, %v850_v12 }
 0x107   : > { %v854_v14 = vsub.f32 0.0, %v853_v13 }
 0x109   : > { %v855_v17 = vmul.f32 1.442695, %v854_v14 }
 0x10b   : > { %1411 = vpow2.f32 %v855_v17 }
 0x10c   : > { %v816_v19 = vpop.permute.xlu0 %815 }
 0x10d   : > { %v818_v20 = vmul.f32 %v816_v19, %v810_v2 }
 0x10f   : > { %v826_v21 = vadd.f32 %v825_v18, %v818_v20 }
 0x111   : > { %828 = vst.msk [vmem:[%s788_s20] sm:$0xff] %vm827_vm0, %v826_v21  ;;  %s1599_s20 = smov [#allocation10]  }
 0x112   : > { %s1479_s14 = sshll.u32 %s1599_s20, 4  ;;  %s1480_s14 = int_to_ptr.vmem [resolvable:$false] %s1479_s14 }
 0x113   : > { %s1481_s3 = scalar_lea.vmem %s1480_s14, 256  ;;  %p1482_p12 = scmp.lt.s32.totalorder %s1916_s24, %s1480_s14 }
 0x114   : > { %p1483_p1 = scmp.lt.s32.totalorder %s1481_s3, %s1475_s9 }
 0x115   : > { %v1412_v22 = vpop.eup %1411 }
 0x116   : > { %v857_v23 = vadd.f32 1.0, %v1412_v22  ;;  %p1484_p2 = por %p1483_p1, %p1482_p12 }
 0x118   : > { %1413 = vrcp.f32 %v857_v23  ;;  %p1485_p9 = pnand %p1484_p2, %p1478_p10 }
 0x122   : > { %v1414_v27 = vpop.eup %1413 }
 0x123   : > { %v866_v28 = vmul.f32 %v1414_v27, %v1326_v26 }
 0x125   : > { %v867_v29 = vadd.f32 %v866_v28, %v860_v24 }
 0x127   : > { %vm868_vm2 = vcmp.gt.f32.partialorder %v867_v29, 0.9  ;;  %vm872_vm3 = vcmp.le.f32.partialorder %v867_v29, 0.9 }
 0x128   : > { %v1328_v30 = vsel %vm872_vm3, 1.0, %v1598_v25  ;;  %v1327_v31 = vsel %vm868_vm2, 1.0, %v1598_v25 }
 0x129   : > { %v875_v33 = vmul.f32 %v1328_v30, %v1326_v26  ;;  %v871_v35 = vmul.f32 %v1327_v31, %v1326_v26 }
 0x12b   : > { %v876_v34 = vmul.f32 %v1414_v27, %v875_v33  ;;  %v883_v36 = vadd.f32 %v875_v33, %v862_v32 }
 0x12d   : > { %v877_v37 = vadd.f32 %v876_v34, %v860_v24  ;;  %v884_v38 = vadd.f32 %v883_v36, %v871_v35 }
 0x12f   : > { %v878_v39 = vsub.f32 1.0, %v877_v37  ;;  %890 = vst.msk [vmem:[%s749_s18] sm:$0xff] %vm886_vm4, %v884_v38 }
 0x130   : > { %1488 = shalt.err (!%p1485_p9)
}
 0x131   : > { %s1489_s18 = scalar_lea.hbm %s1914_s27, 128  ;;  %s1493_s5 = scalar_lea.hbm %s2023_s16, 256 }
 0x132   : > { %p1490_p11 = scmp.ne.s32.totalorder %s1914_s27, %s1489_s18  ;;  %p1494_p13 = scmp.lt.u32.totalorder %s1914_s27, %s2023_s16 }
 0x133   : > { %p1495_p8 = scmp.lt.u32.totalorder %s1493_s5, %s1489_s18  ;;  %p1497_p5 = scmp.lt.u32.totalorder %s1489_s18, %s1914_s27 }
 0x134   : > { %p1491_p3 = pnand %p1490_p11, %p2063_p7 }
 0x135   : > { %p1496_p0 = por %p1495_p8, %p1494_p13 }
 0x136   : > { %p1492_p6 = pneg %p1491_p3 }
 0x137   : > { %p1498_p4 = por %p1497_p5, %p1496_p0 }
 0x139   : > { %p1499_p10 = pnand %p1498_p4, %p1492_p6 }
 0x13b   : > { %1502 = shalt.err (!%p1499_p10)
}
 0x13c   : > { %1340 = dma.vmem_to_hbm [thread:$0]  (%p2063_p7), %s1916_s24, 128, %s1914_s27, %s925_s19   ;;  %v879_v41 = vmul.f32 %v878_v39, %v871_v35 }
 0x13d   : > { %s809_s14 = scalar_lea.vmem %s2022_s15, %s1865_s22  ;;  %s733_s3 = scalar_lea.vmem [#allocation9], %s1849_s25 }
 0x13e   : > { %v880_v42 = vadd.f32 %v879_v41, %v861_v40  ;;  %s948_s18 = sshll.u32 %s733_s3, 4  ;;  %s802_s5 = scalar_lea.vmem %s2020_s13, %s1865_s22  ;;  %s1958_s18 = int_to_ptr.vmem [resolvable:$true] %s948_s18 }
 0x13f   : > { %s2064_s19 = sld [smem:[#allocation26_spill]]  ;;  %s913_s25 = scalar_lea.sflag [#allocation6], %s1846_s30 }
 0x140   : > { %v881_v43 = vmul.f32 %v880_v42, %v871_v35  ;;  %889 = vst.msk [vmem:[%s809_s14] sm:$0xff] %vm886_vm4, %v880_v42  ;;  %s1503_s0 = scalar_lea.vmem %s1958_s18, 128  ;;  %s1600_s28 = smov [#allocation9]  }
 0x141   : > { %p1504_p12 = scmp.ne.s32.totalorder %s1958_s18, %s1503_s0  ;;  %s1507_s22 = sshll.u32 %s1600_s28, 4  ;;  %s1508_s22 = int_to_ptr.vmem [resolvable:$false] %s1507_s22 }
 0x142   : > { %v882_v44 = vadd.f32 %v881_v43, %v877_v37  ;;  %v885_v45 = vadd.f32 %v881_v43, %v876_v34  ;;  %p1510_p9 = scmp.lt.s32.totalorder %s1958_s18, %s1508_s22 }
 0x143   : > { %p1505_p1 = pnand %p1504_p12, %p2063_p7 }
 0x144   : > { %887 = vst.msk [vmem:[%s802_s5] sm:$0xff] %vm886_vm4, %v885_v45  ;;  %888 = vst.msk [vmem:[%s733_s3] sm:$0xff] %vm886_vm4, %v882_v44 }
 0x145   : > { %s1956_s26 = scalar_lea.hbm %s2064_s19, %s1331_s10  ;;  %p1506_p2 = pneg %p1505_p1 }
 0x146   : > { %s1509_s10 = scalar_lea.vmem %s1508_s22, 256 }
 0x147   : > { %p1511_p11 = scmp.lt.s32.totalorder %s1509_s10, %s1503_s0 }
 0x149   : > { %p1512_p3 = por %p1511_p11, %p1510_p9 }
 0x14b   : > { %p1513_p6 = pnand %p1512_p3, %p1506_p2 }
 0x14d   : > { %1516 = shalt.err (!%p1513_p6)
}
 0x14e   : > { %s1517_s30 = scalar_lea.hbm %s1956_s26, 128  ;;  %s1521_s14 = scalar_lea.hbm %s2064_s19, 256 }
 0x14f   : > { %p1518_p13 = scmp.ne.s32.totalorder %s1956_s26, %s1517_s30  ;;  %p1522_p5 = scmp.lt.u32.totalorder %s1956_s26, %s2064_s19 }
 0x150   : > { %p1523_p4 = scmp.lt.u32.totalorder %s1521_s14, %s1517_s30  ;;  %p1525_p12 = scmp.lt.u32.totalorder %s1517_s30, %s1956_s26 }
 0x151   : > { %p1519_p8 = pnand %p1518_p13, %p2063_p7 }
 0x152   : > { %p1524_p10 = por %p1523_p4, %p1522_p5 }
 0x153   : > { %p1520_p0 = pneg %p1519_p8 }
 0x154   : > { %p1526_p1 = por %p1525_p12, %p1524_p10 }
 0x156   : > { %p1527_p2 = pnand %p1526_p1, %p1520_p0 }
 0x158   : > { %1530 = shalt.err (!%p1527_p2)
}
 0x159   : > { %1339 = dma.vmem_to_hbm [thread:$0]  (%p2063_p7), %s1958_s18, 128, %s1956_s26, %s913_s25  }
 0x15a PF: > { %s2065_s23 = sld [smem:[#allocation16_spill]]  ;;  %s2066_s5 = sld [smem:[#allocation22_spill]] }
 0x15b   : > { %p2068_p11 = scmp.ge.s32.totalorder %s1593_s29, 2 }
 0x160   : > { %s1007_s24 = sand.u32 1, %s2065_s23   ;;  %p2067_p9 = scmp.ne.s32.totalorder %s2066_s5, 0 }
 0x161   : > { %s1008_s27 = scalar_lea.sflag [#allocation6], %s1007_s24 }
 0x162   : > { %p1351_p3 = pnand %p2068_p11, %p2067_p9 }
 0x164   : > { %1564 = dma.done.wait (!%p1351_p3), %s1008_s27, 128  }
 0x165   : > { %1566 = vsyncadd (!%p1351_p3), %s1008_s27, 4294967168  ;;  %s1027_s0 = scalar_lea.sflag [#allocation11], %s1007_s24 }
 0x166   : > { %1568 = dma.done.wait (!%p1351_p3), %s1027_s0, 128  }
 0x167   : > { %1570 = vsyncadd (!%p1351_p3), %s1027_s0, 4294967168  ;;  %s41_s29 = sadd.s32 1, %s1593_s29   ;;  %s2069_s25 = sld [smem:[#allocation17_spill]] }
 0x168   : > { %p38_p6 = scmp.ge.s32.totalorder %s41_s29, 4   ;;  %s2070_s26 = sld [smem:[#allocation18_spill]] }
 0x169   : > { %s2071_s27 = sld [smem:[#allocation21_spill]]  ;;  %s2072_s28 = sld [smem:[#allocation19_spill]] }
 0x16a   : > { %s2073_s9 = sld [smem:[#allocation20_spill]]  ;;  %40 = sbr.rel (!%p38_p6) target bundleno = 17 (0x11), region = 203 }
 0x171   :  { %1032 = vsyncpa [#allocation5], 1 }
 0x172   :  { %1034 = vsyncpa [#allocation5 + $0x1], 1 }
 0x173   :  { %1035 = vsyncpa [#allocation8], 1 }
 0x174   :  { %1037 = vsyncpa [#allocation8 + $0x1], 1 }
 0x175   :  { %1038 = vsyncpa [#allocation6], 1 }
 0x176   :  { %1040 = vsyncpa [#allocation6 + $0x1], 1 }
 0x177   :  { %1041 = vsyncpa [#allocation11], 1 }
 0x178   :  { %1043 = vsyncpa [#allocation11 + $0x1], 1 }

</bundles_post_ra>
